<compile_context>
chip_gen: v7x
topology: tpu7x:2x2x1
jax: 0.10.0
libtpu: 0.0.40
codegen_flags: <defaults>
</compile_context>

<pallas_src>
import functools

import jax
import jax.numpy as jnp
from jax.experimental import pallas as pl
from jax.experimental.pallas import tpu as pltpu


def _round_up(x, m):
    return ((x + m - 1) // m) * m


def _bf16_elementwise_ok():
    """bf16 VPU/EUP exists on v6e/v7x; v5e and older lack it (keep tanh in f32).

    Misdetection is only a perf issue (bf16 tanh still lowers everywhere).
    """
    try:
        kind = jax.devices()[0].device_kind.lower()
    except Exception:
        return False
    return not any(tag in kind for tag in ("v2", "v3", "v4", "v5"))


def critic_mlp_kernel(x_ref, w1_ref, b1_ref, w2_ref, b2_ref, w3_ref, b3_ref,
                      out_ref, *, matmul_dtype, activation_dtype):
    """One batch tile: x (TB, D) -> value row (1, TB), lane-dense."""
    x = x_ref[...].astype(matmul_dtype)

    # fc1: MXU matmul (f32 accumulate) + bias; tanh in activation_dtype
    # (bf16 on v6e/v7x halves EUP work; f32 on v5e).
    a1 = jnp.dot(x, w1_ref[...], preferred_element_type=jnp.float32) + b1_ref[...]
    h1 = jnp.tanh(a1.astype(activation_dtype))

    # fc2 + tanh
    a2 = jnp.dot(h1.astype(matmul_dtype), w2_ref[...],
                 preferred_element_type=jnp.float32) + b2_ref[...]
    h2 = jnp.tanh(a2.astype(activation_dtype))

    # fc3: (1, H) x (TB, H)^T -> (1, TB) on the MXU; lane-dense output row.
    v = jax.lax.dot_general(
        w3_ref[...], h2.astype(matmul_dtype),
        dimension_numbers=(((1,), (1,)), ((), ())),
        preferred_element_type=jnp.float32)
    out_ref[...] = v + b3_ref[0, 0]

    # TODO(synk): at very large block_b (>16K rows), sub-chunk h1/h2 with a
    # lax.fori_loop(unroll=True) to bound VMEM staging traffic.


def critic_mlp_forward(global_state, params, *, block_b=4096,
                       matmul_dtype=jnp.bfloat16, activation_dtype=None):
    """Batched critic forward: value = fc3(tanh(fc2(tanh(fc1(x))))).

    block_b: target rows per grid step.  Large tiles (2048-8192) amortize the
      ~0.35us fixed per-step cost; the footprint even at 8192 rows is only a
      few MB, well inside every generation's VMEM.  Clamped/rounded internally
      so block shapes are always legal for any B.
    matmul_dtype: dtype of the MXU operands (bf16 fast path or f32 exact).
    activation_dtype: dtype for bias-add + tanh.  None -> bf16 on chips with a
      bf16 VPU/EUP (v6e/v7x) when matmul_dtype is bf16, else f32 (v5e & older).
    """
    w1, b1, w2, b2, w3_row, b3 = params
    B, D = global_state.shape
    H = w1.shape[1]

    if activation_dtype is None:
        if (jnp.dtype(matmul_dtype) == jnp.dtype(jnp.bfloat16)
                and _bf16_elementwise_ok()):
            activation_dtype = jnp.bfloat16
        else:
            activation_dtype = jnp.float32

    # Effective batch tile: a single sublane-aligned tile for small B,
    # otherwise a multiple of 128 so the lane-dense output blocks are legal.
    if B <= block_b:
        block_b_eff = _round_up(B, 8)
        nb = 1
    else:
        block_b_eff = max(128, (block_b // 128) * 128)
        nb = pl.cdiv(B, block_b_eff)
    padded_b = nb * block_b_eff

    # Pre-cast weights once (VMEM-resident across the grid); biases stay f32.
    w1m = w1.astype(matmul_dtype)
    w2m = w2.astype(matmul_dtype)
    w3m = w3_row.astype(matmul_dtype)
    b1f = b1.astype(jnp.float32).reshape(1, H)
    b2f = b2.astype(jnp.float32).reshape(1, H)
    b3f = b3.astype(jnp.float32).reshape(1, 1)

    # VMEM budget: x/out double-buffers + resident weights + generous h1/h2
    # staging.  Capped at 48 MiB so it is safe on v7x's 64 MiB VMEM as well.
    w_bytes = jnp.dtype(matmul_dtype).itemsize
    x_bytes = jnp.dtype(global_state.dtype).itemsize
    est = (2 * block_b_eff * D * x_bytes          # x double-buffer
           + 2 * block_b_eff * 4                  # out double-buffer
           + (D * H + H * H + H) * w_bytes        # resident weights
           + 3 * H * 4                            # biases
           + 4 * block_b_eff * H * 4)             # h1/h2 staging
    vmem_limit = int(min(max(32 << 20, 2 * est), 48 << 20))

    kernel = functools.partial(critic_mlp_kernel,
                               matmul_dtype=matmul_dtype,
                               activation_dtype=activation_dtype)

    out_row = pl.pallas_call(
        kernel,
        out_shape=jax.ShapeDtypeStruct((1, padded_b), jnp.float32),
        grid_spec=pltpu.PrefetchScalarGridSpec(
            num_scalar_prefetch=0,
            grid=(nb,),
            in_specs=[
                # x streams one (block_b_eff, D) tile per step.  A partial last
                # tile relies on Pallas edge-block handling: garbage rows are
                # bounded by tanh and their outputs are sliced off below.
                pl.BlockSpec((block_b_eff, D), lambda i: (i, 0)),
                # Weights / biases: constant block index -> DMA'd once, then
                # VMEM-resident for the whole grid.
                pl.BlockSpec((D, H), lambda i: (0, 0)),      # w1
                pl.BlockSpec((1, H), lambda i: (0, 0)),      # b1
                pl.BlockSpec((H, H), lambda i: (0, 0)),      # w2
                pl.BlockSpec((1, H), lambda i: (0, 0)),      # b2
                pl.BlockSpec((1, H), lambda i: (0, 0)),      # w3 (row form)
                # b3 as an SMEM scalar (no padded VMEM tile / DMA).
                pl.BlockSpec(memory_space=pltpu.MemorySpace.SMEM),
            ],
            # Lane-dense output: one (1, block_b_eff) f32 row per grid step.
            out_specs=pl.BlockSpec((1, block_b_eff), lambda i: (0, i)),
        ),
        compiler_params=pltpu.CompilerParams(
            # Batch tiles are independent.
            # TODO(synk): on v7x, verify with a profile that both TensorCores
            # run; if not, switch this axis to pltpu.CORE_PARALLEL.
            dimension_semantics=("parallel",),
            vmem_limit_bytes=vmem_limit),
    )(global_state, w1m, b1f, w2m, b2f, w3m, b3f)

    return out_row.reshape(-1)[:B].reshape(B, 1)


def make_params(key, global_state_dim, hidden_dim=64):
    """Orthogonal weights (PyTorch orthogonal_ analogue), zero biases.

    PyTorch nn.Linear stores weight as (out_features, in_features) and applies
    x @ W.T; we generate at that shape and transpose so the kernel does x @ W.
    fc3's weight is kept as a (1, hidden_dim) row.
    """
    k1, k2, k3 = jax.random.split(key, 3)
    ortho = jax.nn.initializers.orthogonal(scale=1.0)
    w1 = ortho(k1, (hidden_dim, global_state_dim), jnp.float32).T   # (D, H)
    w2 = ortho(k2, (hidden_dim, hidden_dim), jnp.float32).T         # (H, H)
    w3 = ortho(k3, (1, hidden_dim), jnp.float32)                    # (1, H) row
    b1 = jnp.zeros((1, hidden_dim), jnp.float32)
    b2 = jnp.zeros((1, hidden_dim), jnp.float32)
    b3 = jnp.zeros((1, 1), jnp.float32)
    return (w1, b1, w2, b2, w3, b3)


def _reference(global_state, params):
    """Pure-JAX reference for correctness check."""
    w1, b1, w2, b2, w3_row, b3 = params
    h1 = jnp.tanh(global_state @ w1 + b1)
    h2 = jnp.tanh(h1 @ w2 + b2)
    return jnp.sum(h2 * w3_row, axis=-1, keepdims=True) + b3


if __name__ == "__main__":
    B = 8                   # small batch of global states for the test
    GLOBAL_STATE_DIM = 32   # global_state_dim
    HIDDEN_DIM = 64         # hidden_dim (module default)

    key = jax.random.PRNGKey(0)
    k_params, k_x, k_bias, k_x2 = jax.random.split(key, 4)

    params = make_params(k_params, GLOBAL_STATE_DIM, HIDDEN_DIM)
    # The module initializes biases to zero; use small non-zero biases so the
    # bias-add / SMEM-scalar paths are actually exercised.
    w1, b1, w2, b2, w3, b3 = params
    kb1, kb2, kb3 = jax.random.split(k_bias, 3)
    params = (w1, 0.1 * jax.random.normal(kb1, b1.shape, jnp.float32),
              w2, 0.1 * jax.random.normal(kb2, b2.shape, jnp.float32),
              w3, 0.1 * jax.random.normal(kb3, b3.shape, jnp.float32))

    global_state = jax.random.normal(k_x, (B, GLOBAL_STATE_DIM), jnp.float32)
    ref = _reference(global_state, params)

    # Exact path: f32 MXU operands, f32 tanh.
    v_f32 = critic_mlp_forward(global_state, params,
                               matmul_dtype=jnp.float32,
                               activation_dtype=jnp.float32)
    v_f32 = jax.block_until_ready(v_f32)
    assert v_f32.shape == (B, 1)
    assert jnp.allclose(v_f32, ref, atol=1e-4, rtol=1e-4)

    # Fast path: bf16 MXU operands; bf16 tanh auto-enabled only on v6e/v7x.
    v_bf16 = critic_mlp_forward(global_state, params,
                                matmul_dtype=jnp.bfloat16)
    v_bf16 = jax.block_until_ready(v_bf16)
    assert v_bf16.shape == (B, 1)
    assert jnp.allclose(v_bf16, ref, atol=5e-2, rtol=5e-2)

    # Multi-tile, non-divisible batch (B % block_b != 0): exercises the no-pad
    # edge-block path -- garbage tail rows must only land in discarded outputs.
    B2 = 300
    global_state2 = jax.random.normal(k_x2, (B2, GLOBAL_STATE_DIM), jnp.float32)
    ref2 = _reference(global_state2, params)
    v2 = critic_mlp_forward(global_state2, params, block_b=128,
                            matmul_dtype=jnp.float32,
                            activation_dtype=jnp.float32)
    v2 = jax.block_until_ready(v2)
    assert v2.shape == (B2, 1)
    assert jnp.allclose(v2, ref2, atol=1e-4, rtol=1e-4)

    print("KERNEL_OK")
</pallas_src>

<mosaic_0001>
module attributes {stable_mosaic.version = 11 : i64} {
  func.func @critic_mlp_kernel(%arg0: i32, %arg1: memref<8x32xf32, #tpu.memory_space<vmem>>, %arg2: memref<32x64xf32, #tpu.memory_space<vmem>>, %arg3: memref<1x64xf32, #tpu.memory_space<vmem>>, %arg4: memref<64x64xf32, #tpu.memory_space<vmem>>, %arg5: memref<1x64xf32, #tpu.memory_space<vmem>>, %arg6: memref<1x64xf32, #tpu.memory_space<vmem>>, %arg7: memref<1x1xf32, #tpu.memory_space<smem>>, %arg8: memref<1x8xf32, #tpu.memory_space<vmem>>) attributes {dimension_semantics = [#tpu.dimension_semantics<parallel>], iteration_bounds = array<i64: 1>, scalar_prefetch = 0 : i64, scratch_operands = 0 : i64, tpu.core_type = #tpu.core_type<tc>, window_params = [{transform_indices = @transform_0, window_bounds = array<i64: 8, 32>}, {pipeline_mode = #tpu.pipeline_mode<synchronous>, transform_indices = @transform_1, window_bounds = array<i64: 32, 64>}, {pipeline_mode = #tpu.pipeline_mode<synchronous>, transform_indices = @transform_2, window_bounds = array<i64: 1, 64>}, {pipeline_mode = #tpu.pipeline_mode<synchronous>, transform_indices = @transform_3, window_bounds = array<i64: 64, 64>}, {pipeline_mode = #tpu.pipeline_mode<synchronous>, transform_indices = @transform_4, window_bounds = array<i64: 1, 64>}, {pipeline_mode = #tpu.pipeline_mode<synchronous>, transform_indices = @transform_5, window_bounds = array<i64: 1, 64>}, {transform_indices = @transform_6, window_bounds = array<i64: 1, 1>}, {transform_indices = @transform_7, window_bounds = array<i64: 1, 8>}]} {
    %c0 = arith.constant 0 : index
    %c0_0 = arith.constant 0 : index
    %0 = vector.load %arg1[%c0, %c0_0] : memref<8x32xf32, #tpu.memory_space<vmem>>, vector<8x32xf32>
    %c0_1 = arith.constant 0 : index
    %c0_2 = arith.constant 0 : index
    %1 = vector.load %arg2[%c0_1, %c0_2] : memref<32x64xf32, #tpu.memory_space<vmem>>, vector<32x64xf32>
    %cst = arith.constant dense<0.000000e+00> : vector<8x64xf32>
    %2 = tpu.matmul %0, %1, %cst {dimension_numbers = #tpu.dot_dimension_numbers<[1], [0], [0], [1], [0, 0, 1, 1], [], []>} : vector<8x32xf32>, vector<32x64xf32>, vector<8x64xf32> -> vector<8x64xf32>
    %c0_3 = arith.constant 0 : index
    %c0_4 = arith.constant 0 : index
    %3 = vector.load %arg3[%c0_3, %c0_4] : memref<1x64xf32, #tpu.memory_space<vmem>>, vector<1x64xf32>
    %4 = vector.broadcast %3 : vector<1x64xf32> to vector<8x64xf32>
    %5 = arith.addf %2, %4 : vector<8x64xf32>
    %6 = math.tanh %5 : vector<8x64xf32>
    %c0_5 = arith.constant 0 : index
    %c0_6 = arith.constant 0 : index
    %7 = vector.load %arg4[%c0_5, %c0_6] : memref<64x64xf32, #tpu.memory_space<vmem>>, vector<64x64xf32>
    %cst_7 = arith.constant dense<0.000000e+00> : vector<8x64xf32>
    %8 = tpu.matmul %6, %7, %cst_7 {dimension_numbers = #tpu.dot_dimension_numbers<[1], [0], [0], [1], [0, 0, 1, 1], [], []>} : vector<8x64xf32>, vector<64x64xf32>, vector<8x64xf32> -> vector<8x64xf32>
    %c0_8 = arith.constant 0 : index
    %c0_9 = arith.constant 0 : index
    %9 = vector.load %arg5[%c0_8, %c0_9] : memref<1x64xf32, #tpu.memory_space<vmem>>, vector<1x64xf32>
    %10 = vector.broadcast %9 : vector<1x64xf32> to vector<8x64xf32>
    %11 = arith.addf %8, %10 : vector<8x64xf32>
    %12 = math.tanh %11 : vector<8x64xf32>
    %c0_10 = arith.constant 0 : index
    %c0_11 = arith.constant 0 : index
    %13 = vector.load %arg6[%c0_10, %c0_11] : memref<1x64xf32, #tpu.memory_space<vmem>>, vector<1x64xf32>
    %cst_12 = arith.constant dense<0.000000e+00> : vector<1x8xf32>
    %14 = tpu.matmul %13, %12, %cst_12 {dimension_numbers = #tpu.dot_dimension_numbers<[1], [1], [0], [0], [0, 0, 1, 0], [], []>} : vector<1x64xf32>, vector<8x64xf32>, vector<1x8xf32> -> vector<1x8xf32>
    %c0_13 = arith.constant 0 : index
    %c0_14 = arith.constant 0 : index
    %15 = memref.load %arg7[%c0_13, %c0_14] : memref<1x1xf32, #tpu.memory_space<smem>>
    %16 = vector.broadcast %15 : f32 to vector<1x8xf32>
    %17 = arith.addf %14, %16 : vector<1x8xf32>
    %c0_15 = arith.constant 0 : index
    %c0_16 = arith.constant 0 : index
    %18 = vector.load %arg8[%c0_15, %c0_16] : memref<1x8xf32, #tpu.memory_space<vmem>>, vector<1x8xf32>
    tpu.vector_store %arg8[%c0_15, %c0_16], %17 {strides = array<i32>} : memref<1x8xf32, #tpu.memory_space<vmem>>, vector<1x8xf32>,
    return
  }
  func.func @transform_0(%arg0: i32) -> (i32, i32) {
    %c0_i32 = arith.constant 0 : i32
    %c0_i32_0 = arith.constant 0 : i32
    return %arg0, %c0_i32 : i32, i32
  }
  func.func @transform_1(%arg0: i32) -> (i32, i32) {
    %c0_i32 = arith.constant 0 : i32
    %c0_i32_0 = arith.constant 0 : i32
    %c0_i32_1 = arith.constant 0 : i32
    return %c0_i32, %c0_i32_0 : i32, i32
  }
  func.func @transform_2(%arg0: i32) -> (i32, i32) {
    %c0_i32 = arith.constant 0 : i32
    %c0_i32_0 = arith.constant 0 : i32
    %c0_i32_1 = arith.constant 0 : i32
    return %c0_i32, %c0_i32_0 : i32, i32
  }
  func.func @transform_3(%arg0: i32) -> (i32, i32) {
    %c0_i32 = arith.constant 0 : i32
    %c0_i32_0 = arith.constant 0 : i32
    %c0_i32_1 = arith.constant 0 : i32
    return %c0_i32, %c0_i32_0 : i32, i32
  }
  func.func @transform_4(%arg0: i32) -> (i32, i32) {
    %c0_i32 = arith.constant 0 : i32
    %c0_i32_0 = arith.constant 0 : i32
    %c0_i32_1 = arith.constant 0 : i32
    return %c0_i32, %c0_i32_0 : i32, i32
  }
  func.func @transform_5(%arg0: i32) -> (i32, i32) {
    %c0_i32 = arith.constant 0 : i32
    %c0_i32_0 = arith.constant 0 : i32
    %c0_i32_1 = arith.constant 0 : i32
    return %c0_i32, %c0_i32_0 : i32, i32
  }
  func.func @transform_6(%arg0: i32) -> (i32, i32) {
    %c0_i32 = arith.constant 0 : i32
    %c0_i32_0 = arith.constant 0 : i32
    %c0_i32_1 = arith.constant 0 : i32
    return %c0_i32, %c0_i32_0 : i32, i32
  }
  func.func @transform_7(%arg0: i32) -> (i32, i32) {
    %c0_i32 = arith.constant 0 : i32
    %c0_i32_0 = arith.constant 0 : i32
    return %c0_i32, %arg0 : i32, i32
  }
}

</mosaic_0001>

<bundles_post_ra>
// kernel: tpu_custom_call.1
= control target key start
LH: loop header
LB: loop body
LE: loop exit
PB: predicated region body
PF: predicated region fallthrough
CT: control target
= control target key end

     0   :  { %13 = vsyncpa [#allocation4], 0  ;;  %s641_s0 = inlined_call_operand.hbm [shape: f32[8,32], index: 0, kind: input, shape index: {}]   ;;  %s642_s1 = inlined_call_operand.hbm [shape: f32[32,64], index: 1, kind: input, shape index: {}]   ;;  %s643_s2 = inlined_call_operand.vmem [shape: f32[1,64], index: 2, kind: input, shape index: {}]   ;;  %s644_s3 = inlined_call_operand.hbm [shape: f32[64,64], index: 3, kind: input, shape index: {}]   ;;  %s645_s4 = inlined_call_operand.vmem [shape: f32[1,64], index: 4, kind: input, shape index: {}]   ;;  %s646_s5 = inlined_call_operand.vmem [shape: f32[1,64], index: 5, kind: input, shape index: {}]   ;;  %s647_s6 = inlined_call_operand.<no memory space> [shape: f32[1,1], index: 6, kind: input, shape index: {}]   ;;  %s648_s7 = inlined_call_operand.hbm [shape: f32[1,8], index: 7, kind: output, shape index: {}]  }
   0x1   :  { %14 = vsyncpa [#allocation7], 0 }
   0x2   :  { %15 = vsyncpa [#allocation5], 0  ;;  %s523_s24 = smov [#allocation6]   ;;  %s429_s28 = scalar_lea.hbm %s642_s1, 512 }
   0x3   :  { %s31_s25 = sshll.u32 %s523_s24, 4  ;;  %p430_p0 = scmp.ne.s32.totalorder %s642_s1, %s429_s28  ;;  %s32_s25 = int_to_ptr.vmem [resolvable:$true] %s31_s25 }
   0x4   :  { %p433_p1 = scmp.lt.u32.totalorder %s429_s28, %s642_s1 }
   0x6   :  { %p435_p2 = pnand %p433_p1, %p430_p0 }
   0x8   :  { %438 = shalt.err (!%p435_p2)
}
   0x9   :  { %s439_s10 = scalar_lea.vmem %s32_s25, 512  ;;  %p444_p4 = scmp.lt.s32.totalorder %s32_s25, %s32_s25 }
   0xa   :  { %p440_p3 = scmp.ne.s32.totalorder %s32_s25, %s439_s10  ;;  %p445_p5 = scmp.lt.s32.totalorder %s439_s10, %s439_s10 }
   0xc   :  { %p446_p6 = por %p445_p5, %p444_p4 }
   0xe   :  { %p447_p7 = pnand %p446_p6, %p440_p3 }
  0x10   :  { %450 = shalt.err (!%p447_p7)
}
  0x11   :  { %s524_s11 = smov 128   ;;  %s525_s12 = smov 8  }
  0x12   :  { %37 = dma.hbm_to_vmem [thread:$0]  %s642_s1, 512, %s32_s25, [#allocation7], %s524_s11, %s524_s11, %s525_s12  }
  0x13   :  { %s526_s15 = smov [#allocation3]   ;;  %s527_s17 = smov [#allocation8]  }
  0x14   :  { %s22_s16 = sshll.u32 %s526_s15, 4  ;;  %s45_s18 = sshll.u32 %s527_s17, 4  ;;  %s23_s16 = int_to_ptr.vmem [resolvable:$true] %s22_s16  ;;  %s46_s18 = int_to_ptr.vmem [resolvable:$true] %s45_s18 }
  0x15   :  { %s451_s21 = scalar_lea.hbm %s641_s0, 128 }
  0x16   :  { %p452_p8 = scmp.ne.s32.totalorder %s641_s0, %s451_s21  ;;  %p455_p9 = scmp.lt.u32.totalorder %s451_s21, %s641_s0 }
  0x18   :  { %p457_p10 = pnand %p455_p9, %p452_p8 }
  0x1a   :  { %460 = shalt.err (!%p457_p10)
}
  0x1b   :  { %s461_s1 = scalar_lea.vmem %s23_s16, 128  ;;  %p466_p12 = scmp.lt.s32.totalorder %s23_s16, %s23_s16 }
  0x1c   :  { %p462_p11 = scmp.ne.s32.totalorder %s23_s16, %s461_s1  ;;  %p467_p13 = scmp.lt.s32.totalorder %s461_s1, %s461_s1 }
  0x1e   :  { %p468_p0 = por %p467_p13, %p466_p12 }
  0x20   :  { %p469_p1 = pnand %p468_p0, %p462_p11 }
  0x22   :  { %472 = shalt.err (!%p469_p1)
}
  0x23   :  { %25 = dma.hbm_to_vmem [thread:$0]  %s641_s0, 128, %s23_s16, [#allocation4]  }
  0x24   :  { %s473_s30 = scalar_lea.hbm %s644_s3, 1024 }
  0x25   :  { %p474_p2 = scmp.ne.s32.totalorder %s644_s3, %s473_s30  ;;  %p477_p3 = scmp.lt.u32.totalorder %s473_s30, %s644_s3 }
  0x27   :  { %p479_p4 = pnand %p477_p3, %p474_p2 }
  0x29   :  { %482 = shalt.err (!%p479_p4)
}
  0x2a   :  { %s483_s14 = scalar_lea.vmem %s46_s18, 1024  ;;  %p488_p6 = scmp.lt.s32.totalorder %s46_s18, %s46_s18 }
  0x2b   :  { %p484_p5 = scmp.ne.s32.totalorder %s46_s18, %s483_s14  ;;  %p489_p7 = scmp.lt.s32.totalorder %s483_s14, %s483_s14 }
  0x2d   :  { %p490_p8 = por %p489_p7, %p488_p6 }
  0x2f   :  { %p491_p9 = pnand %p490_p8, %p484_p5 }
  0x31   :  { %494 = shalt.err (!%p491_p9)
}
  0x32   :  { %51 = dma.hbm_to_vmem [thread:$0]  %s644_s3, 1024, %s46_s18, [#allocation7], %s524_s11, %s524_s11, %s525_s12  }
  0x33   :  { %517 = dma.done.wait [#allocation4], 128  }
  0x34   :  { %518 = vsyncadd [#allocation4], 4294967168 }
  0x35   :  { %519 = dma.done.wait [#allocation7], 1536  }
  0x36   :  { %520 = vsyncadd [#allocation7], 4294965760  ;;  %v528_v0 = vmov 0.0|0.0   ;;  %vm529_vm0 = vmmov 0   ;;  %v530_v1 = vmov 0.0   ;;  %v68_v2 = vld [vmem:[#allocation6] sm:$0xff]  ;;  %v246_v32 = vstv %s647_s6 }
  0x37   :  { %398 = vmatprep.subr.bf16.mxu0 %v528_v0  ;;  %371 = vmatprep.mubr.msk.f32.mxu0 %vm529_vm0, %v530_v1  ;;  %v69_v3 = vld [vmem:[#allocation6 + $0x8] sm:$0xff]  ;;  %v70_v4 = vld [vmem:[#allocation6 + $0x10] sm:$0xff]  ;;  %v71_v6 = vld [vmem:[#allocation6 + $0x18] sm:$0xff]  ;;  %vm79_vm1 = vcmask 261120   ;;  %vm169_vm2 = vcmask 523264   ;;  %s531_s20 = smov [#allocation9]  }
  0x38   :  { %404 = vmatprep.subr.bf16.mxu1 %v528_v0  ;;  %390 = vmatprep.mubr.msk.f32.mxu1 %vm529_vm0, %v530_v1  ;;  %v399_v5 = vpack.c.bf16 %v69_v3, %v68_v2  ;;  %v154_v7 = vld [vmem:[#allocation8] sm:$0xff]  ;;  %v155_v8 = vld [vmem:[#allocation8 + $0x8] sm:$0xff]  ;;  %v402_v9 = vpack.c.bf16 %v71_v6, %v70_v4  ;;  %v67_v11 = vld [vmem:[#allocation3] sm:$0xff]  ;;  %s331_s21 = sshll.u32 %s531_s20, 4  ;;  %vm323_vm3 = vcmask 57344   ;;  %s332_s21 = int_to_ptr.vmem [resolvable:$true] %s331_s21 }
  0x39   :  { %v405_v10 = vpack.c.bf16 %v155_v8, %v154_v7  ;;  %v156_v12 = vld [vmem:[#allocation8 + $0x10] sm:$0xff]  ;;  %v157_v13 = vld [vmem:[#allocation8 + $0x18] sm:$0xff]  ;;  %v158_v15 = vld [vmem:[#allocation8 + $0x20] sm:$0xff]  ;;  %s499_s22 = scalar_lea.vmem %s332_s21, 32  ;;  %p500_p11 = scmp.lt.s32.totalorder %s332_s21, %s332_s21 }
  0x3a   :  { %400 = vmatpush3.bf16.msra.mxu0 %v399_v5  ;;  %v408_v14 = vpack.c.bf16 %v157_v13, %v156_v12  ;;  %v159_v16 = vld [vmem:[#allocation8 + $0x28] sm:$0xff]  ;;  %v160_v18 = vld [vmem:[#allocation8 + $0x30] sm:$0xff]  ;;  %v161_v19 = vld [vmem:[#allocation8 + $0x38] sm:$0xff] }
  0x3b   :  { %401 = vmatprep.subr.bf16.mxu0 %v528_v0  ;;  %406 = vmatpush3.bf16.msra.mxu1 %v405_v10  ;;  %v411_v17 = vpack.c.bf16 %v159_v16, %v158_v15  ;;  %v414_v20 = vpack.c.bf16 %v161_v19, %v160_v18  ;;  %v341_v21 = vld [vmem:[%s643_s2] ss:$0 sm:$0xff] }
  0x3c   :  { %407 = vmatprep.subr.bf16.mxu1 %v528_v0  ;;  %v343_v26 = vld [vmem:[%s645_s4] ss:$0 sm:$0xff]  ;;  %s495_s4 = scalar_lea.vmem %s332_s21, 16 }
  0x3d   :  { %v244_v31 = vld [vmem:[%s646_s5] sm:$0x1]  ;;  %p496_p10 = scmp.ne.s32.totalorder %s332_s21, %s495_s4  ;;  %p501_p12 = scmp.lt.s32.totalorder %s499_s22, %s495_s4 }
  0x3e   :  { %403 = vmatpush3.bf16.msra.mxu0 %v402_v9 }
  0x3f   :  { %393 = vmatprep.subr.mxu0 %v530_v1  ;;  %409 = vmatpush3.bf16.msra.mxu1 %v408_v14  ;;  %p502_p13 = por %p501_p12, %p500_p11 }
  0x40   :  { %410 = vmatprep.subr.bf16.mxu1 %v528_v0 }
  0x41   :  { %372 = vmatmul.mubr.msk.f32.vlgmr.msra.gmra.mrb[0].mxu0 %vm79_vm1, %v67_v11  ;;  %p503_p0 = pnand %p502_p13, %p496_p10 }
  0x42   :  { %395 = vmatprep.mubr.msk.f32.mxu0 %vm529_vm0, %v530_v1 }
  0x43   :  { %412 = vmatpush3.bf16.msra.mxu1 %v411_v17 }
  0x44   :  { %413 = vmatprep.subr.bf16.mxu1 %v528_v0 }
  0x47   :  { %415 = vmatpush3.bf16.msra.mxu1 %v414_v20 }
 0x114   :  { %v149_v22 = vpop.f32.mrb[0].mxu0 }
 0x115   :  { %v150_v23 = vadd.f32 %v341_v21, %v149_v22  ;;  %v373_v24 = vpop.f32.mrb[1].mxu0 }
 0x117   :  { %425 = vtanh.f32 %v150_v23 }
 0x121   :  { %v426_v25 = vpop.eup %425 }
 0x122   :  { %391 = vmatmul.mubr.msk.f32.vlgmr.msra.gmra.mrb[0].mxu1 %vm169_vm2, %v426_v25 }
 0x1f5   :  { %v239_v27 = vpop.f32.mrb[0].mxu1 }
 0x1f6   :  { %v240_v28 = vadd.f32 %v343_v26, %v239_v27  ;;  %v392_v29 = vpop.f32.mrb[1].mxu1 }
 0x1f8   :  { %427 = vtanh.f32 %v240_v28 }
 0x202   :  { %v428_v30 = vpop.eup %427 }
 0x203   :  { %394 = vmatpush3.xpose.msk.msra.mxu0 %vm169_vm2, %v428_v30 }
 0x206   :  { %396 = vmatmul.mubr.msk.f32.vlgmr.msra.gmra.mrb[2].mxu0 %vm169_vm2, %v244_v31 }
 0x2d9   :  { %v319_v33 = vpop.f32.mrb[2].mxu0 }
 0x2da   :  { %v320_v34 = vadd.f32 %v319_v33, %v246_v32  ;;  %v397_v35 = vpop.f32.mrb[3].mxu0 }
 0x2dc   :  { %324 = vst.msk [vmem:[#allocation9] sm:$0x1] %vm323_vm3, %v320_v34 }
 0x2dd   :  { %506 = shalt.err (!%p503_p0)
}
 0x2de   :  { %s507_s6 = scalar_lea.hbm %s648_s7, 16 }
 0x2df   :  { %p508_p1 = scmp.ne.s32.totalorder %s648_s7, %s507_s6  ;;  %p511_p2 = scmp.lt.u32.totalorder %s507_s6, %s648_s7 }
 0x2e1   :  { %p513_p3 = pnand %p511_p2, %p508_p1 }
 0x2e3   :  { %516 = shalt.err (!%p513_p3)
}
 0x2e4   :  { %334 = dma.vmem_to_hbm [thread:$0]  %s332_s21, 16, %s648_s7, [#allocation5]  }
 0x2e5   :  { %521 = dma.done.wait [#allocation5], 16  }
 0x2e6   :  { %522 = vsyncadd [#allocation5], 4294967280 }
 0x2e7   :  { %338 = vsyncpa [#allocation4], 1 }
 0x2e8   :  { %339 = vsyncpa [#allocation7], 1 }
 0x2e9   :  { %340 = vsyncpa [#allocation5], 1 }

</bundles_post_ra>
